<compile_context>
chip_gen: v7x
topology: tpu7x:2x2x1
jax: 0.10.0
libtpu: 0.0.40
codegen_flags: <defaults>
</compile_context>

<pallas_src>
import math

import jax
import jax.numpy as jnp
from jax.experimental import pallas as pl
from jax.experimental.pallas import tpu as pltpu


def _make_cross_attention_kernel(num_heads: int, head_dim: int,
                                 batch_block: int, t1: int, t2: int, c: int):
    scale = 1.0 / math.sqrt(head_dim)
    H, D = num_heads, head_dim

    def kernel(x_ref, ctx_ref,
               wq_ref, bq_ref, wkv_ref, bkv_ref, wp_ref, bp_ref,
               o_ref):
        # Fold the batch block into the matmul M dimension: one MXU pass per
        # projection instead of one per (batch, head).
        xf = x_ref[...].reshape(batch_block * t1, c)     # (Bblk*T1, C)
        cf = ctx_ref[...].reshape(batch_block * t2, c)   # (Bblk*T2, C)

        # Q projection: single (Bblk*T1, C) x (C, C) matmul.
        q = jnp.dot(xf, wq_ref[...], preferred_element_type=jnp.float32) + bq_ref[...]
        # Fused K/V projection: single (Bblk*T2, C) x (C, 2C) matmul.
        kv = jnp.dot(cf, wkv_ref[...], preferred_element_type=jnp.float32) + bkv_ref[...]
        k = kv[:, :c]
        v = kv[:, c:]

        # Head-major layout with a single leading batch axis (Bblk*H): the
        # attention matmuls are plain batched einsums — no per-head lane
        # slicing, no explicit k.T (contraction is on the last axis of both
        # operands), heads scheduled back-to-back through the MXU.
        q = (q * scale).reshape(batch_block, t1, H, D).transpose(0, 2, 1, 3)
        q = q.reshape(batch_block * H, t1, D)
        k = k.reshape(batch_block, t2, H, D).transpose(0, 2, 1, 3)
        k = k.reshape(batch_block * H, t2, D)
        v = v.reshape(batch_block, t2, H, D).transpose(0, 2, 1, 3)
        v = v.reshape(batch_block * H, t2, D)

        att = jnp.einsum('bqd,bkd->bqk', q, k,
                         preferred_element_type=jnp.float32)     # (Bblk*H, T1, T2)
        # softmax along the key axis (f32 elementwise; exp -> EUP, recip -> EUP).
        att = att - jnp.max(att, axis=-1, keepdims=True)
        p = jnp.exp(att)
        p = p * pl.reciprocal(jnp.sum(p, axis=-1, keepdims=True), approx=True)
        # attn_drop is identity (eval mode).

        y = jnp.einsum('bqk,bkd->bqd', p.astype(v.dtype), v,
                       preferred_element_type=jnp.float32)       # (Bblk*H, T1, D)
        # 'b h t e -> b t (h e)': back to a lane-dense (Bblk*T1, C) slab.
        y = y.reshape(batch_block, H, t1, D).transpose(0, 2, 1, 3)
        y = y.reshape(batch_block * t1, c)

        # Output projection (resid_drop is identity in eval mode).
        out = jnp.dot(y, wp_ref[...], preferred_element_type=jnp.float32) + bp_ref[...]
        o_ref[...] = out.reshape(batch_block, t1, c).astype(o_ref.dtype)

    return kernel


def _pick_batch_block(B: int) -> int:
    """Largest divisor of B that yields >= 2 grid steps (megacore sharding)."""
    if B < 2:
        return B
    for d in range(B // 2, 0, -1):
        if B % d == 0:
            return d
    return B


def cross_attention_pallas(x, context, params, *, num_heads: int, batch_block=None):
    """x: (B, T1, C), context: (B, T2, C). Returns (B, T1, C)."""
    B, T1, C = x.shape
    Bc, T2, Cc = context.shape
    assert Bc == B and Cc == C
    assert C % num_heads == 0
    head_dim = C // num_heads

    wq, bq, wk, bk, wv, bv, wp, bp = params  # w*: (C, C), b*: (1, C)

    # Fuse K and V projection weights into one (C, 2C) operand (done once,
    # outside the kernel).
    wkv = jnp.concatenate([wk, wv], axis=1)   # (C, 2C)
    bkv = jnp.concatenate([bk, bv], axis=1)   # (1, 2C)

    if batch_block is None:
        batch_block = _pick_batch_block(B)
    assert B % batch_block == 0

    kernel = _make_cross_attention_kernel(num_heads, head_dim, batch_block, T1, T2, C)

    const2d = lambda b: (0, 0)

    # Advisory cost estimate (flops: 2 projs + fused KV proj + 2 attn matmuls).
    flops = (2 * B * T1 * C * C          # Q proj
             + 2 * B * T2 * C * (2 * C)  # fused K/V proj
             + 2 * B * T1 * T2 * C       # q @ k^T (all heads)
             + 2 * B * T1 * T2 * C       # att @ v (all heads)
             + 2 * B * T1 * C * C)       # output proj
    transcendentals = B * num_heads * T1 * T2  # exp in softmax
    bytes_accessed = 4 * (x.size + context.size
                          + wq.size + bq.size + wkv.size + bkv.size
                          + wp.size + bp.size + B * T1 * C)

    # NOTE: for production C (e.g. 2048) pass weights as bf16 and raise
    # vmem_limit_bytes via pltpu.CompilerParams (v7x VMEM is 64 MiB).
    return pl.pallas_call(
        kernel,
        out_shape=jax.ShapeDtypeStruct((B, T1, C), x.dtype),
        grid_spec=pltpu.PrefetchScalarGridSpec(
            num_scalar_prefetch=0,
            grid=(B // batch_block,),
            in_specs=[
                pl.BlockSpec((batch_block, T1, C), lambda b: (b, 0, 0)),   # x
                pl.BlockSpec((batch_block, T2, C), lambda b: (b, 0, 0)),   # context
                pl.BlockSpec((C, C), const2d),        # wq
                pl.BlockSpec((1, C), const2d),        # bq
                pl.BlockSpec((C, 2 * C), const2d),    # wkv (fused K|V)
                pl.BlockSpec((1, 2 * C), const2d),    # bkv
                pl.BlockSpec((C, C), const2d),        # wp
                pl.BlockSpec((1, C), const2d),        # bp
            ],
            out_specs=pl.BlockSpec((batch_block, T1, C), lambda b: (b, 0, 0)),
        ),
        compiler_params=pltpu.CompilerParams(
            dimension_semantics=("parallel",)),
        cost_estimate=pl.CostEstimate(flops=flops,
                                      transcendentals=transcendentals,
                                      bytes_accessed=bytes_accessed),
    )(x, context, wq, bq, wkv, bkv, wp, bp)


def cross_attention_reference(x, context, params, *, num_heads: int):
    """Pure-JAX reference mirroring the PyTorch forward (dropout disabled)."""
    wq, bq, wk, bk, wv, bv, wp, bp = params
    B, T1, C = x.shape
    _, T2, _ = context.shape
    D = C // num_heads
    q = (x @ wq + bq).reshape(B, T1, num_heads, D).transpose(0, 2, 1, 3)
    k = (context @ wk + bk).reshape(B, T2, num_heads, D).transpose(0, 2, 1, 3)
    v = (context @ wv + bv).reshape(B, T2, num_heads, D).transpose(0, 2, 1, 3)
    att = (q @ k.transpose(0, 1, 3, 2)) * (1.0 / math.sqrt(D))
    att = jax.nn.softmax(att, axis=-1)
    y = att @ v                                    # (B, H, T1, D)
    y = y.transpose(0, 2, 1, 3).reshape(B, T1, C)  # 'b h t e -> b t (h e)'
    return y @ wp + bp


def init_params(key, embed_dim):
    """Deterministic init of the four Linear layers (weights pre-transposed)."""
    keys = jax.random.split(key, 8)
    bound = 1.0 / math.sqrt(embed_dim)
    params = []
    for i in range(4):
        w = jax.random.uniform(keys[2 * i], (embed_dim, embed_dim),
                               jnp.float32, -bound, bound)
        b = jax.random.uniform(keys[2 * i + 1], (1, embed_dim),
                               jnp.float32, -bound, bound)
        params.extend([w, b])
    return tuple(params)


if __name__ == "__main__":
    # Small config consistent with MaskTransformerConfig: embed_dim=32, num_heads=4.
    B, T1, T2, C, H = 2, 8, 16, 32, 4

    key = jax.random.PRNGKey(0)
    kx, kc, kp = jax.random.split(key, 3)
    x = jax.random.normal(kx, (B, T1, C), jnp.float32)
    context = jax.random.normal(kc, (B, T2, C), jnp.float32)
    params = init_params(kp, C)

    out = cross_attention_pallas(x, context, params, num_heads=H)
    out = jax.block_until_ready(out)

    ref = cross_attention_reference(x, context, params, num_heads=H)
    assert out.shape == (B, T1, C)
    # Tolerance accounts for the approximate (EUP) softmax reciprocal.
    assert jnp.allclose(out, ref, atol=5e-3, rtol=5e-3), "mismatch vs reference"

    # TODO(synk): attn_drop / resid_drop are eval-mode identities (no RNG dropout).
    print("KERNEL_OK")
</pallas_src>

<mosaic_0001>
module attributes {stable_mosaic.version = 11 : i64} {
  func.func @kernel(%arg0: i32, %arg1: memref<1x8x32xf32, #tpu.memory_space<vmem>>, %arg2: memref<1x16x32xf32, #tpu.memory_space<vmem>>, %arg3: memref<32x32xf32, #tpu.memory_space<vmem>>, %arg4: memref<1x32xf32, #tpu.memory_space<vmem>>, %arg5: memref<32x64xf32, #tpu.memory_space<vmem>>, %arg6: memref<1x64xf32, #tpu.memory_space<vmem>>, %arg7: memref<32x32xf32, #tpu.memory_space<vmem>>, %arg8: memref<1x32xf32, #tpu.memory_space<vmem>>, %arg9: memref<1x8x32xf32, #tpu.memory_space<vmem>>) attributes {dimension_semantics = [#tpu.dimension_semantics<parallel>], iteration_bounds = array<i64: 2>, scalar_prefetch = 0 : i64, scratch_operands = 0 : i64, tpu.core_type = #tpu.core_type<tc>, window_params = [{transform_indices = @transform_0, window_bounds = array<i64: 1, 8, 32>}, {transform_indices = @transform_1, window_bounds = array<i64: 1, 16, 32>}, {pipeline_mode = #tpu.pipeline_mode<synchronous>, transform_indices = @transform_2, window_bounds = array<i64: 32, 32>}, {pipeline_mode = #tpu.pipeline_mode<synchronous>, transform_indices = @transform_3, window_bounds = array<i64: 1, 32>}, {pipeline_mode = #tpu.pipeline_mode<synchronous>, transform_indices = @transform_4, window_bounds = array<i64: 32, 64>}, {pipeline_mode = #tpu.pipeline_mode<synchronous>, transform_indices = @transform_5, window_bounds = array<i64: 1, 64>}, {pipeline_mode = #tpu.pipeline_mode<synchronous>, transform_indices = @transform_6, window_bounds = array<i64: 32, 32>}, {pipeline_mode = #tpu.pipeline_mode<synchronous>, transform_indices = @transform_7, window_bounds = array<i64: 1, 32>}, {transform_indices = @transform_8, window_bounds = array<i64: 1, 8, 32>}]} {
    %c0 = arith.constant 0 : index
    %c0_0 = arith.constant 0 : index
    %c0_1 = arith.constant 0 : index
    %0 = vector.load %arg1[%c0, %c0_0, %c0_1] : memref<1x8x32xf32, #tpu.memory_space<vmem>>, vector<1x8x32xf32>
    %1 = vector.shape_cast %0 : vector<1x8x32xf32> to vector<8x32xf32>
    %c0_2 = arith.constant 0 : index
    %c0_3 = arith.constant 0 : index
    %c0_4 = arith.constant 0 : index
    %2 = vector.load %arg2[%c0_2, %c0_3, %c0_4] : memref<1x16x32xf32, #tpu.memory_space<vmem>>, vector<1x16x32xf32>
    %3 = vector.shape_cast %2 : vector<1x16x32xf32> to vector<16x32xf32>
    %c0_5 = arith.constant 0 : index
    %c0_6 = arith.constant 0 : index
    %4 = vector.load %arg3[%c0_5, %c0_6] : memref<32x32xf32, #tpu.memory_space<vmem>>, vector<32x32xf32>
    %cst = arith.constant dense<0.000000e+00> : vector<8x32xf32>
    %5 = tpu.matmul %1, %4, %cst {dimension_numbers = #tpu.dot_dimension_numbers<[1], [0], [0], [1], [0, 0, 1, 1], [], []>} : vector<8x32xf32>, vector<32x32xf32>, vector<8x32xf32> -> vector<8x32xf32>
    %c0_7 = arith.constant 0 : index
    %c0_8 = arith.constant 0 : index
    %6 = vector.load %arg4[%c0_7, %c0_8] : memref<1x32xf32, #tpu.memory_space<vmem>>, vector<1x32xf32>
    %7 = vector.broadcast %6 : vector<1x32xf32> to vector<8x32xf32>
    %8 = arith.addf %5, %7 : vector<8x32xf32>
    %c0_9 = arith.constant 0 : index
    %c0_10 = arith.constant 0 : index
    %9 = vector.load %arg5[%c0_9, %c0_10] : memref<32x64xf32, #tpu.memory_space<vmem>>, vector<32x64xf32>
    %cst_11 = arith.constant dense<0.000000e+00> : vector<16x64xf32>
    %10 = tpu.matmul %3, %9, %cst_11 {dimension_numbers = #tpu.dot_dimension_numbers<[1], [0], [0], [1], [0, 0, 1, 1], [], []>} : vector<16x32xf32>, vector<32x64xf32>, vector<16x64xf32> -> vector<16x64xf32>
    %c0_12 = arith.constant 0 : index
    %c0_13 = arith.constant 0 : index
    %11 = vector.load %arg6[%c0_12, %c0_13] : memref<1x64xf32, #tpu.memory_space<vmem>>, vector<1x64xf32>
    %12 = vector.broadcast %11 : vector<1x64xf32> to vector<16x64xf32>
    %13 = arith.addf %10, %12 : vector<16x64xf32>
    %14 = vector.extract_strided_slice %13 {offsets = [0, 0], sizes = [16, 32], strides = [1, 1]} : vector<16x64xf32> to vector<16x32xf32>
    %15 = vector.extract_strided_slice %13 {offsets = [0, 32], sizes = [16, 32], strides = [1, 1]} : vector<16x64xf32> to vector<16x32xf32>
    %cst_14 = arith.constant 0.353553385 : f32
    %16 = vector.broadcast %cst_14 : f32 to vector<8x32xf32>
    %17 = arith.mulf %8, %16 : vector<8x32xf32>
    %18 = vector.shape_cast %17 : vector<8x32xf32> to vector<1x8x4x8xf32>
    %19 = tpu.transpose %18, [0, 2, 1, 3] : vector<1x8x4x8xf32> -> vector<1x4x8x8xf32>
    %20 = vector.shape_cast %19 : vector<1x4x8x8xf32> to vector<4x8x8xf32>
    %21 = vector.shape_cast %14 : vector<16x32xf32> to vector<1x16x4x8xf32>
    %22 = tpu.transpose %21, [0, 2, 1, 3] : vector<1x16x4x8xf32> -> vector<1x4x16x8xf32>
    %23 = vector.shape_cast %22 : vector<1x4x16x8xf32> to vector<4x16x8xf32>
    %24 = vector.shape_cast %15 : vector<16x32xf32> to vector<1x16x4x8xf32>
    %25 = tpu.transpose %24, [0, 2, 1, 3] : vector<1x16x4x8xf32> -> vector<1x4x16x8xf32>
    %26 = vector.shape_cast %25 : vector<1x4x16x8xf32> to vector<4x16x8xf32>
    "tpu.trace_start"() <{level = 10 : i32, message = "bqd,bkd->bqk"}> : () -> ()
    %cst_15 = arith.constant dense<0.000000e+00> : vector<4x8x16xf32>
    %27 = tpu.matmul %20, %23, %cst_15 {dimension_numbers = #tpu.dot_dimension_numbers<[2], [2], [1], [1], [0, 0, 0, 1, 1, 1], [0], [0]>} : vector<4x8x8xf32>, vector<4x16x8xf32>, vector<4x8x16xf32> -> vector<4x8x16xf32>
    "tpu.trace_stop"() : () -> ()
    %cst_16 = arith.constant dense<0xFF800000> : vector<4x8xf32>
    %28 = vector.multi_reduction <maximumf>, %27, %cst_16 [2] : vector<4x8x16xf32> to vector<4x8xf32>
    %29 = vector.shape_cast %28 : vector<4x8xf32> to vector<4x8x1xf32>
    %30 = vector.broadcast %29 : vector<4x8x1xf32> to vector<4x8x16xf32>
    %31 = arith.subf %27, %30 : vector<4x8x16xf32>
    %32 = math.exp %31 : vector<4x8x16xf32>
    %cst_17 = arith.constant dense<0.000000e+00> : vector<4x8xf32>
    %33 = vector.multi_reduction <add>, %32, %cst_17 [2] : vector<4x8x16xf32> to vector<4x8xf32>
    %34 = vector.shape_cast %33 : vector<4x8xf32> to vector<4x8x1xf32>
    %35 = tpu.reciprocal %34 {approx = true} : vector<4x8x1xf32> -> vector<4x8x1xf32>
    %36 = vector.broadcast %35 : vector<4x8x1xf32> to vector<4x8x16xf32>
    %37 = arith.mulf %32, %36 : vector<4x8x16xf32>
    "tpu.trace_start"() <{level = 10 : i32, message = "bqk,bkd->bqd"}> : () -> ()
    %cst_18 = arith.constant dense<0.000000e+00> : vector<4x8x8xf32>
    %38 = tpu.matmul %37, %26, %cst_18 {dimension_numbers = #tpu.dot_dimension_numbers<[2], [1], [1], [2], [0, 0, 0, 1, 1, 2], [0], [0]>} : vector<4x8x16xf32>, vector<4x16x8xf32>, vector<4x8x8xf32> -> vector<4x8x8xf32>
    "tpu.trace_stop"() : () -> ()
    %39 = vector.shape_cast %38 : vector<4x8x8xf32> to vector<1x4x8x8xf32>
    %40 = tpu.transpose %39, [0, 2, 1, 3] : vector<1x4x8x8xf32> -> vector<1x8x4x8xf32>
    %41 = vector.shape_cast %40 : vector<1x8x4x8xf32> to vector<8x32xf32>
    %c0_19 = arith.constant 0 : index
    %c0_20 = arith.constant 0 : index
    %42 = vector.load %arg7[%c0_19, %c0_20] : memref<32x32xf32, #tpu.memory_space<vmem>>, vector<32x32xf32>
    %cst_21 = arith.constant dense<0.000000e+00> : vector<8x32xf32>
    %43 = tpu.matmul %41, %42, %cst_21 {dimension_numbers = #tpu.dot_dimension_numbers<[1], [0], [0], [1], [0, 0, 1, 1], [], []>} : vector<8x32xf32>, vector<32x32xf32>, vector<8x32xf32> -> vector<8x32xf32>
    %c0_22 = arith.constant 0 : index
    %c0_23 = arith.constant 0 : index
    %44 = vector.load %arg8[%c0_22, %c0_23] : memref<1x32xf32, #tpu.memory_space<vmem>>, vector<1x32xf32>
    %45 = vector.broadcast %44 : vector<1x32xf32> to vector<8x32xf32>
    %46 = arith.addf %43, %45 : vector<8x32xf32>
    %47 = vector.shape_cast %46 : vector<8x32xf32> to vector<1x8x32xf32>
    %c0_24 = arith.constant 0 : index
    %c0_25 = arith.constant 0 : index
    %c0_26 = arith.constant 0 : index
    %48 = vector.load %arg9[%c0_24, %c0_25, %c0_26] : memref<1x8x32xf32, #tpu.memory_space<vmem>>, vector<1x8x32xf32>
    tpu.vector_store %arg9[%c0_24, %c0_25, %c0_26], %47 {strides = array<i32>} : memref<1x8x32xf32, #tpu.memory_space<vmem>>, vector<1x8x32xf32>,
    return
  }
  func.func @transform_0(%arg0: i32) -> (i32, i32, i32) {
    %c0_i32 = arith.constant 0 : i32
    %c0_i32_0 = arith.constant 0 : i32
    %c0_i32_1 = arith.constant 0 : i32
    return %arg0, %c0_i32, %c0_i32_0 : i32, i32, i32
  }
  func.func @transform_1(%arg0: i32) -> (i32, i32, i32) {
    %c0_i32 = arith.constant 0 : i32
    %c0_i32_0 = arith.constant 0 : i32
    %c0_i32_1 = arith.constant 0 : i32
    return %arg0, %c0_i32, %c0_i32_0 : i32, i32, i32
  }
  func.func @transform_2(%arg0: i32) -> (i32, i32) {
    %c0_i32 = arith.constant 0 : i32
    %c0_i32_0 = arith.constant 0 : i32
    %c0_i32_1 = arith.constant 0 : i32
    return %c0_i32, %c0_i32_0 : i32, i32
  }
  func.func @transform_3(%arg0: i32) -> (i32, i32) {
    %c0_i32 = arith.constant 0 : i32
    %c0_i32_0 = arith.constant 0 : i32
    %c0_i32_1 = arith.constant 0 : i32
    return %c0_i32, %c0_i32_0 : i32, i32
  }
  func.func @transform_4(%arg0: i32) -> (i32, i32) {
    %c0_i32 = arith.constant 0 : i32
    %c0_i32_0 = arith.constant 0 : i32
    %c0_i32_1 = arith.constant 0 : i32
    return %c0_i32, %c0_i32_0 : i32, i32
  }
  func.func @transform_5(%arg0: i32) -> (i32, i32) {
    %c0_i32 = arith.constant 0 : i32
    %c0_i32_0 = arith.constant 0 : i32
    %c0_i32_1 = arith.constant 0 : i32
    return %c0_i32, %c0_i32_0 : i32, i32
  }
  func.func @transform_6(%arg0: i32) -> (i32, i32) {
    %c0_i32 = arith.constant 0 : i32
    %c0_i32_0 = arith.constant 0 : i32
    %c0_i32_1 = arith.constant 0 : i32
    return %c0_i32, %c0_i32_0 : i32, i32
  }
  func.func @transform_7(%arg0: i32) -> (i32, i32) {
    %c0_i32 = arith.constant 0 : i32
    %c0_i32_0 = arith.constant 0 : i32
    %c0_i32_1 = arith.constant 0 : i32
    return %c0_i32, %c0_i32_0 : i32, i32
  }
  func.func @transform_8(%arg0: i32) -> (i32, i32, i32) {
    %c0_i32 = arith.constant 0 : i32
    %c0_i32_0 = arith.constant 0 : i32
    %c0_i32_1 = arith.constant 0 : i32
    return %arg0, %c0_i32, %c0_i32_0 : i32, i32, i32
  }
}

</mosaic_0001>

<bundles_post_ra>
// kernel: tpu_custom_call.1
= control target key start
LH: loop header
LB: loop body
LE: loop exit
PB: predicated region body
PF: predicated region fallthrough
CT: control target
= control target key end

     0   :  { %s3553_s0 = inlined_call_operand.hbm [shape: f32[2,8,32], index: 0, kind: input, shape index: {}]   ;;  %s3554_s1 = inlined_call_operand.hbm [shape: f32[2,16,32], index: 1, kind: input, shape index: {}]   ;;  %s3555_s2 = inlined_call_operand.hbm [shape: f32[32,32], index: 2, kind: input, shape index: {}]   ;;  %s3556_s3 = inlined_call_operand.vmem [shape: f32[1,32], index: 3, kind: input, shape index: {}]   ;;  %s3557_s4 = inlined_call_operand.hbm [shape: f32[32,64], index: 4, kind: input, shape index: {}]   ;;  %s3558_s5 = inlined_call_operand.vmem [shape: f32[1,64], index: 5, kind: input, shape index: {}]   ;;  %s3559_s6 = inlined_call_operand.hbm [shape: f32[32,32], index: 6, kind: input, shape index: {}]   ;;  %s3560_s7 = inlined_call_operand.vmem [shape: f32[1,32], index: 7, kind: input, shape index: {}]   ;;  %s3561_s8 = inlined_call_operand.hbm [shape: f32[2,8,32], index: 8, kind: output, shape index: {}]  }
   0x1   :  { %3569 = sst [smem:[#allocation19_spill]] %s3553_s0 }
   0x2   :  { %3570 = sst [smem:[#allocation20_spill]] %s3555_s2 }
   0x3   :  { %13 = vsyncpa [#allocation3], 0 }
   0x4   :  { %15 = vsyncpa [#allocation3 + $0x1], 0 }
   0x5   :  { %16 = vsyncpa [#allocation6], 0 }
   0x6   :  { %18 = vsyncpa [#allocation6 + $0x1], 0 }
   0x7   :  { %19 = vsyncpa [#allocation9], 0 }
   0x8   :  { %20 = vsyncpa [#allocation4], 0 }
   0x9   :  { %22 = vsyncpa [#allocation4 + $0x1], 0  ;;  %s2981_s27 = smov 0   ;;  %s2983_s28 = smov 0  }
   0xa   :  { %s2985_s29 = smov 0   ;;  %s2987_s30 = smov 0  }
   0xb LB: > { %3571 = sst [smem:[#allocation17_spill]] %s2902_s27  ;;  %s3002_s9 = sadd.s32 4294967295, %s2914_s30   ;;  %s2914_s30 = sphi %s2987_s30, %s3600_s30   ;;  %s2910_s29 = sphi %s2985_s29, %s3599_s29   ;;  %s2906_s28 = sphi %s2983_s28, %s3598_s28   ;;  %s2902_s27 = sphi %s2981_s27, %s3597_s27  }
   0xc   : > { %s2345_s10 = sadd.s32 4294967294, %s2914_s30   ;;  %p48_p0 = scmp.ne.s32.totalorder %s2906_s28, %s2902_s27 }
   0xd   : > { %p3562_p1 = scmp.eq.s32.totalorder %s3002_s9, 0  ;;  %p230_p3 = scmp.eq.s32.totalorder %s2345_s10, 1 }
   0xe   : > { %p2346_p5 = scmp.ge.s32.totalorder %s2914_s30, 1  ;;  %p237_p7 = scmp.lt.s32.totalorder %s2914_s30, 3 }
   0xf   : > { %p3011_p4 = por %p3562_p1, %p48_p0  ;;  %p3016_p6 = por %p230_p3, %p48_p0 }
  0x10   : > { %p3021_p8 = pnand %p2346_p5, %p237_p7  ;;  %s2916_s14 = smov [#allocation7]  }
  0x11   : > { %s3572_s11 = scalar_select %p3011_p4, 1, 0 }
  0x12   : > { %s3573_s12 = scalar_select %p3016_p6, 1, 0 }
  0x13   : > { %s3575_s13 = scalar_select %p3021_p8, 1, 0 }
  0x14   : > { %3574 = sst [smem:[#allocation18_spill]] %s3573_s12  ;;  %s249_s15 = sshll.u32 %s2916_s14, 4  ;;  %s3025_s15 = int_to_ptr.vmem [resolvable:$true] %s249_s15 }
  0x15   : > { %p2598_p9 = pneg %p3021_p8  ;;  %s2917_s17 = smov [#allocation8]  }
  0x16   : > { %s265_s18 = sshll.u32 %s2917_s17, 4  ;;  %s2918_s19 = smov [#allocation10]   ;;  %s3036_s18 = int_to_ptr.vmem [resolvable:$true] %s265_s18 }
  0x17   : > { %p3032_p11 = pnand %p2598_p9, %p3562_p1  ;;  %s3038_s20 = sshll.u32 %s2918_s19, 4  ;;  %s282_s20 = int_to_ptr.vmem [resolvable:$true] %s3038_s20 }
  0x18   : > { %s3577_s2 = sld [smem:[#allocation20_spill]] }
  0x19   : > { %p3048_p13 = pneg %p3032_p11 }
  0x1e   : > { %s2692_s23 = scalar_lea.hbm %s3577_s2, 512 }
  0x1f   : > { %p2693_p12 = scmp.ne.s32.totalorder %s3577_s2, %s2692_s23  ;;  %p2699_p5 = scmp.lt.u32.totalorder %s2692_s23, %s3577_s2 }
  0x21   : > { %p2695_p0 = pnand %p3048_p13, %p2693_p12 }
  0x23   : > { %p2696_p3 = pneg %p2695_p0 }
  0x25   : > { %p2701_p7 = pnand %p2699_p5, %p2696_p3 }
  0x27   : > { %2704 = shalt.err (!%p2701_p7)
}
  0x28   : > { %s2705_s17 = scalar_lea.vmem %s3025_s15, 512  ;;  %p2713_p2 = scmp.lt.s32.totalorder %s3025_s15, %s3025_s15 }
  0x29   : > { %p2706_p9 = scmp.ne.s32.totalorder %s3025_s15, %s2705_s17  ;;  %p2714_p6 = scmp.lt.s32.totalorder %s2705_s17, %s2705_s17 }
  0x2b   : > { %p2708_p10 = pnand %p2706_p9, %p3048_p13  ;;  %p2715_p12 = por %p2714_p6, %p2713_p2 }
  0x2d   : > { %p2709_p1 = pneg %p2708_p10 }
  0x2f   : > { %p2716_p0 = pnand %p2715_p12, %p2709_p1 }
  0x31   : > { %2719 = shalt.err (!%p2716_p0)
}
  0x32   : > { %s3567_s19 = smov 128   ;;  %s3568_s21 = smov 8  }
  0x33   : > { %2601 = dma.hbm_to_vmem [thread:$0]  (!%p3032_p11), %s3577_s2, 512, %s3025_s15, [#allocation6], %s3567_s19, %s3567_s19, %s3568_s21  }
  0x34   : > { %s2720_s10 = scalar_lea.hbm %s3557_s4, 512 }
  0x35   : > { %p2721_p1 = scmp.ne.s32.totalorder %s3557_s4, %s2720_s10  ;;  %p2727_p10 = scmp.lt.u32.totalorder %s2720_s10, %s3557_s4 }
  0x37   : > { %p2723_p2 = pnand %p2721_p1, %p3048_p13 }
  0x39   : > { %p2724_p6 = pneg %p2723_p2 }
  0x3b   : > { %p2729_p3 = pnand %p2727_p10, %p2724_p6 }
  0x3d   : > { %2732 = shalt.err (!%p2729_p3)
}
  0x3e   : > { %s2733_s15 = scalar_lea.vmem %s3036_s18, 512  ;;  %p2741_p12 = scmp.lt.s32.totalorder %s3036_s18, %s3036_s18 }
  0x3f   : > { %p2734_p5 = scmp.ne.s32.totalorder %s3036_s18, %s2733_s15  ;;  %p2742_p0 = scmp.lt.s32.totalorder %s2733_s15, %s2733_s15 }
  0x41   : > { %p2736_p7 = pnand %p2734_p5, %p3048_p13  ;;  %p2743_p1 = por %p2742_p0, %p2741_p12 }
  0x43   : > { %p2737_p9 = pneg %p2736_p7 }
  0x45   : > { %p2744_p2 = pnand %p2743_p1, %p2737_p9 }
  0x47   : > { %2747 = shalt.err (!%p2744_p2)
}
  0x48   : > { %2604 = dma.hbm_to_vmem [thread:$0]  (!%p3032_p11), %s3557_s4, 512, %s3036_s18, [#allocation9], %s3567_s19, %s3567_s19, %s3568_s21  }
  0x49   : > { %s2748_s24 = scalar_lea.hbm %s3559_s6, 512 }
  0x4a   : > { %p2749_p6 = scmp.ne.s32.totalorder %s3559_s6, %s2748_s24  ;;  %p2755_p5 = scmp.lt.u32.totalorder %s2748_s24, %s3559_s6 }
  0x4c   : > { %p2751_p10 = pnand %p2749_p6, %p3048_p13 }
  0x4e   : > { %p2752_p3 = pneg %p2751_p10 }
  0x50   : > { %p2757_p7 = pnand %p2755_p5, %p2752_p3 }
  0x52   : > { %2760 = shalt.err (!%p2757_p7)
}
  0x53   : > { %s2761_s15 = scalar_lea.vmem %s282_s20, 512  ;;  %p2769_p1 = scmp.lt.s32.totalorder %s282_s20, %s282_s20 }
  0x54   : > { %p2762_p9 = scmp.ne.s32.totalorder %s282_s20, %s2761_s15  ;;  %p2770_p2 = scmp.lt.s32.totalorder %s2761_s15, %s2761_s15 }
  0x56   : > { %p2764_p12 = pnand %p2762_p9, %p3048_p13  ;;  %p2771_p4 = por %p2770_p2, %p2769_p1 }
  0x58   : > { %p2765_p0 = pneg %p2764_p12 }
  0x5a   : > { %p2772_p8 = pnand %p2771_p4, %p2765_p0 }
  0x5c   : > { %2775 = shalt.err (!%p2772_p8)
}
  0x5d   : > { %2607 = dma.hbm_to_vmem [thread:$0]  (!%p3032_p11), %s3559_s6, 512, %s282_s20, [#allocation9], %s3567_s19, %s3567_s19, %s3568_s21  }
  0x5e   : > { %s3121_s26 = sadd.s32 1, %s2914_s30   ;;  %s35_s12 = sadd.s32 1, %s2910_s29 }
  0x5f   : > { %s32_s16 = ssub.s32 %s2914_s30, %s3121_s26  ;;  %p42_p8 = scmp.ne.s32.totalorder %s2910_s29, %s2906_s28 }
  0x60   : > { %p33_p4 = scmp.eq.s32.totalorder %s32_s16, 0  ;;  %p43_p13 = scmp.eq.s32.totalorder %s2914_s30, 0 }
  0x61   : > { %p2622_p6 = scmp.lt.s32.totalorder %s2914_s30, 2  ;;  %p3579_p3 = scmp.eq.s32.totalorder %s3002_s9, 1 }
  0x62   : > { %s3131_s22 = scalar_select %p33_p4, %s2910_s29, %s35_s12  }
  0x63   : > { %p44_p10 = por %p43_p13, %p42_p8  ;;  %p3135_p5 = por %p3579_p3, %p42_p8 }
  0x64   : > { %s3140_s24 = sand.u32 1, %s2910_s29   ;;  %s2352_s20 = sshll.u32 %s2914_s30, 7 }
  0x65   : > { %s2351_s25 = sshll.u32 %s3140_s24, 3  ;;  %s3581_s0 = sld [smem:[#allocation19_spill]] }
  0x66   : > { %s302_s15 = scalar_lea.vmem [#allocation2], %s2351_s25  ;;  %p3149_p11 = pnand %p2622_p6, %p44_p10 }
  0x67   : > { %s309_s18 = sshll.u32 %s302_s15, 4  ;;  %s2353_s16 = sshll.u32 %s3140_s24, 4  ;;  %s3153_s18 = int_to_ptr.vmem [resolvable:$true] %s309_s18 }
  0x68   : > { %s299_s12 = scalar_lea.sflag [#allocation3], %s3140_s24  ;;  %p2778_p9 = pneg %p3149_p11 }
  0x6b   : > { %s3147_s17 = scalar_lea.hbm %s3581_s0, %s2352_s20  ;;  %s2781_s10 = scalar_lea.hbm %s3581_s0, 256 }
  0x6c   : > { %s2776_s19 = scalar_lea.hbm %s3147_s17, 128  ;;  %p2782_p1 = scmp.lt.u32.totalorder %s3147_s17, %s3581_s0 }
  0x6d   : > { %p2777_p7 = scmp.ne.s32.totalorder %s3147_s17, %s2776_s19  ;;  %p2783_p2 = scmp.lt.u32.totalorder %s2781_s10, %s2776_s19 }
  0x6e   : > { %p2785_p8 = scmp.lt.u32.totalorder %s2776_s19, %s3147_s17 }
  0x6f   : > { %p2779_p12 = pnand %p2778_p9, %p2777_p7  ;;  %p2784_p4 = por %p2783_p2, %p2782_p1 }
  0x71   : > { %p2780_p0 = pneg %p2779_p12  ;;  %p2786_p13 = por %p2785_p8, %p2784_p4 }
  0x73   : > { %p2787_p6 = pnand %p2786_p13, %p2780_p0 }
  0x75   : > { %2790 = shalt.err (!%p2787_p6)
}
  0x76   : > { %s2791_s21 = scalar_lea.vmem %s3153_s18, 128  ;;  %s2921_s20 = smov [#allocation2]  }
  0x77   : > { %p2792_p10 = scmp.ne.s32.totalorder %s3153_s18, %s2791_s21  ;;  %s2796_s25 = sshll.u32 %s2921_s20, 4  ;;  %s2797_s25 = int_to_ptr.vmem [resolvable:$false] %s2796_s25 }
  0x78   : > { %s2798_s14 = scalar_lea.vmem %s2797_s25, 256  ;;  %p2799_p12 = scmp.lt.s32.totalorder %s3153_s18, %s2797_s25 }
  0x79   : > { %p2794_p3 = pnand %p2792_p10, %p2778_p9  ;;  %p2800_p1 = scmp.lt.s32.totalorder %s2798_s14, %s2791_s21 }
  0x7b   : > { %p2795_p7 = pneg %p2794_p3  ;;  %p2801_p2 = por %p2800_p1, %p2799_p12 }
  0x7d   : > { %p2802_p4 = pnand %p2801_p2, %p2795_p7 }
  0x7f   : > { %2805 = shalt.err (!%p2802_p4)
}
  0x80   : > { %2611 = dma.hbm_to_vmem [thread:$0]  (!%p3149_p11), %s3147_s17, 128, %s3153_s18, %s299_s12  }
  0x81   : > { %s320_s19 = scalar_lea.vmem [#allocation5], %s2353_s16  ;;  %s316_s15 = sand.u32 1, %s2914_s30  }
  0x82   : > { %s327_s10 = sshll.u32 %s320_s19, 4  ;;  %s2402_s20 = sshll.u32 %s2914_s30, 8  ;;  %s3185_s10 = int_to_ptr.vmem [resolvable:$true] %s327_s10 }
  0x83   : > { %s3191_s14 = scalar_lea.hbm %s3554_s1, %s2402_s20  ;;  %s3193_s0 = scalar_lea.sflag [#allocation6], %s316_s15 }
  0x84   : > { %s2806_s2 = scalar_lea.hbm %s3191_s14, 256  ;;  %s2811_s18 = scalar_lea.hbm %s3554_s1, 512 }
  0x85   : > { %p2807_p0 = scmp.ne.s32.totalorder %s3191_s14, %s2806_s2  ;;  %p2812_p6 = scmp.lt.u32.totalorder %s3191_s14, %s3554_s1 }
  0x86   : > { %p2813_p10 = scmp.lt.u32.totalorder %s2811_s18, %s2806_s2  ;;  %p2815_p7 = scmp.lt.u32.totalorder %s2806_s2, %s3191_s14 }
  0x87   : > { %p2809_p8 = pnand %p2807_p0, %p2778_p9 }
  0x88   : > { %p2814_p3 = por %p2813_p10, %p2812_p6 }
  0x89   : > { %p2810_p13 = pneg %p2809_p8 }
  0x8a   : > { %p2816_p12 = por %p2815_p7, %p2814_p3 }
  0x8c   : > { %p2817_p1 = pnand %p2816_p12, %p2810_p13 }
  0x8e   : > { %2820 = shalt.err (!%p2817_p1)
}
  0x8f   : > { %s2821_s19 = scalar_lea.vmem %s3185_s10, 256  ;;  %s2922_s15 = smov [#allocation5]  }
  0x90   : > { %p2822_p2 = scmp.ne.s32.totalorder %s3185_s10, %s2821_s19  ;;  %s2826_s20 = sshll.u32 %s2922_s15, 4  ;;  %s2827_s20 = int_to_ptr.vmem [resolvable:$false] %s2826_s20 }
  0x91   : > { %s2828_s21 = scalar_lea.vmem %s2827_s20, 512  ;;  %p2829_p8 = scmp.lt.s32.totalorder %s3185_s10, %s2827_s20 }
  0x92   : > { %p2824_p4 = pnand %p2822_p2, %p2778_p9  ;;  %p2830_p6 = scmp.lt.s32.totalorder %s2828_s21, %s2821_s19 }
  0x94   : > { %p2825_p0 = pneg %p2824_p4  ;;  %p2831_p10 = por %p2830_p6, %p2829_p8 }
  0x96   : > { %p2832_p3 = pnand %p2831_p10, %p2825_p0 }
  0x98   : > { %2835 = shalt.err (!%p2832_p3)
}
  0x99   : > { %s3583_s2 = smov 8   ;;  %s3584_s25 = smov 128  }
  0x9a   : > { %2614 = dma.hbm_to_vmem [thread:$0]  (!%p3149_p11), %s3191_s14, 256, %s3185_s10, %s3193_s0, %s3584_s25, %s3584_s25, %s3583_s2  }
  0x9b   : > { %p3585_p9 = scmp.ne.s32.totalorder %s3575_s13, 0 }
  0x9c   : > { %s3225_s24 = sand.u32 (!%p3585_p9), 1, %s2906_s28   ;;  %p3586_p13 = scmp.ne.s32.totalorder (!%p3585_p9), %s3572_s11, 0 }
  0x9d   : > { %339 = sbr.rel (%p3585_p9) target bundleno = 1670 (0x686), region = 52  ;;  %s2357_s17 = sshll.u32 (!%p3585_p9), %s3225_s24, 3 }
  0x9e   : > { %s342_s18 = scalar_lea.sflag (!%p3585_p9), [#allocation3], %s3225_s24  ;;  %s3231_s27 = scalar_lea.vmem (!%p3585_p9), [#allocation2], %s2357_s17 }
  0xa4   : > { %2881 = dma.done.wait (%p3586_p13), %s342_s18, 128  }
  0xa5   : > { %2883 = vsyncadd (%p3586_p13), %s342_s18, 4294967168  ;;  %s350_s0 = sand.u32 1, %s3002_s9   ;;  %s2358_s13 = sshll.u32 %s3225_s24, 4 }
  0xa6   : > { %s351_s10 = scalar_lea.sflag [#allocation6], %s350_s0  ;;  %s3239_s14 = scalar_lea.vmem [#allocation5], %s2358_s13 }
  0xa7   : > { %2885 = dma.done.wait (%p3586_p13), %s351_s10, 256  }
  0xa8   : > { %2887 = vsyncadd (%p3586_p13), %s351_s10, 4294967040  ;;  %p3587_p11 = scmp.eq.s32.totalorder %s3002_s9, 0 }
  0xaa   : > { %2889 = dma.done.wait (%p3587_p11), [#allocation6], 512   ;;  %p3588_p7 = pmov %p3587_p11 }
  0xac   : > { %2891 = vsyncadd (%p3588_p7), [#allocation6], 4294966784  ;;  %p3589_p12 = pmov %p3588_p7 }
  0xad   : > { %p3590_p1 = pmov %p3588_p7 }
  0xae   : > { %2893 = dma.done.wait (%p3589_p12), [#allocation9], 1024  }
  0xaf   : > { %2895 = vsyncadd (%p3590_p1), [#allocation9], 4294966272  ;;  %v2923_v0 = vmov 0.0|0.0   ;;  %vm2924_vm0 = vmmov 0   ;;  %v2925_v1 = vmov 0.0   ;;  %vm418_vm1 = vcmask 261120  }
  0xb0   : > { %2532 = vmatprep.subr.bf16.mxu0 %v2923_v0  ;;  %2451 = vmatprep.mubr.msk.f32.mxu0 %vm2924_vm0, %v2925_v1  ;;  %v492_v2 = vld [vmem:[#allocation8] sm:$0xff]  ;;  %v493_v3 = vld [vmem:[#allocation8 + $0x8] sm:$0xff]  ;;  %v494_v4 = vld [vmem:[#allocation8 + $0x10] sm:$0xff]  ;;  %s2926_s12 = smov 112   ;;  %s2927_s19 = smov 120   ;;  %v600_v29 = vlaneseq  ;;  %vm1319_vm2 = vcmask 64512  }
  0xb1   : > { %v2538_v5 = vpack.c.bf16 %v493_v3, %v492_v2  ;;  %v495_v6 = vld [vmem:[#allocation8 + $0x18] sm:$0xff]  ;;  %v405_v7 = vld [vmem:[%s3239_s14] sm:$0xff]  ;;  %v408_v10 = vld [vmem:[#allocation7 + $0x8] sm:$0xff]  ;;  %s2928_s21 = smov 104   ;;  %v2929_v27 = vmov 1983009808  }
  0xb2   : > { %v2542_v8 = vpack.c.bf16 %v495_v6, %v494_v4  ;;  %2462 = vmatprep.mubr.msk.f32.mxu1 %vm418_vm1, %v405_v7  ;;  %v407_v9 = vld [vmem:[#allocation7] sm:$0xff]  ;;  %v409_v11 = vld [vmem:[#allocation7 + $0x10] sm:$0xff]  ;;  %v410_v13 = vld [vmem:[#allocation7 + $0x18] sm:$0xff]  ;;  %v598_v28 = vunpack.c.l.s4 %v2929_v27  ;;  %v601_v33 = vshrl.u32 %v600_v29, 7  ;;  %v2930_v34 = vmov 1934713408  }
  0xb3   : > { %2539 = vmatprep.subr.bf16.mxu1 %v2538_v5  ;;  %v2533_v12 = vpack.c.bf16 %v408_v10, %v407_v9  ;;  %v2536_v14 = vpack.c.bf16 %v410_v13, %v409_v11  ;;  %v406_v15 = vld [vmem:[%s3239_s14 + $0x8] sm:$0xff]  ;;  %v2365_v17 = vld [vmem:[%s3558_s5] ss:$0 sm:$0xff]  ;;  %v630_v35 = vunpack.c.l.s4 %v2930_v34  ;;  %vm3358_vm3 = vmpackc.low %vm1319_vm2, %vm1319_vm2  ;;  %vm1636_vm4 = vcmask 130048   ;;  %s2931_s2 = smov 96   ;;  %s2932_s25 = smov 16  }
  0xb4   : > { %2541 = vmatpush3.bf16.msra.mxu1 %v2538_v5  ;;  %v404_v16 = vld [vmem:[%s3231_s27] sm:$0xff]  ;;  %v599_v32 = vunpack.c.0.s8 %v598_v28  ;;  %s2933_s18 = smov 8   ;;  %s2934_s27 = smov 24   ;;  %vm2123_vm5 = vcmask 195584  }
  0xb5   : > { %2543 = vmatprep.subr.bf16.mxu1 %v2542_v8  ;;  %2534 = vmatpush3.bf16.msra.mxu0 %v2533_v12  ;;  %v2363_v23 = vld [vmem:[%s3556_s3] ss:$0 sm:$0xff]  ;;  %v631_v41 = vunpack.c.0.s8 %v630_v35  ;;  %s2399_s10 = sshll.u32 %s3002_s9, 7  ;;  %s403_s14 = scalar_lea.vmem [#allocation11], %s2357_s17 }
  0xb6   : > { %2535 = vmatprep.subr.bf16.mxu0 %v2923_v0  ;;  %v3298_v38 = vsub.s32 %v599_v32, %v601_v33  ;;  %s2224_s11 = sshll.u32 %s403_s14, 4  ;;  %s2211_s15 = scalar_lea.sflag [#allocation4], %s3225_s24  ;;  %s3510_s11 = int_to_ptr.vmem [resolvable:$true] %s2224_s11 }
  0xb7   : > { %v3322_v52 = vsub.s32 %v631_v41, %v601_v33  ;;  %s2836_s9 = scalar_lea.vmem %s3510_s11, 128  ;;  %s2935_s17 = smov [#allocation11]  }
  0xb8   : > { %2545 = vmatpush3.bf16.msra.mxu1 %v2542_v8  ;;  %p2837_p2 = scmp.ne.s32.totalorder %s3510_s11, %s2836_s9  ;;  %s2840_s20 = sshll.u32 %s2935_s17, 4  ;;  %s2841_s20 = int_to_ptr.vmem [resolvable:$false] %s2840_s20 }
  0xb9   : > { %2537 = vmatpush3.bf16.msra.mxu0 %v2536_v14  ;;  %2550 = vmatprep.subr.bf16.mxu1 %v2923_v0  ;;  %p2843_p8 = scmp.lt.s32.totalorder %s3510_s11, %s2841_s20 }
  0xba   : > { %2546 = vmatprep.subr.bf16.mxu0 %v2923_v0  ;;  %p2838_p4 = pnand %p2837_p2, %p3135_p5 }
  0xbb   : > { %2463 = vmatmul.mubr.msk.f32.vlgmr.msra.gmra.mrb[0].mxu1 %vm418_vm1, %v406_v15 }
  0xbc   : > { %2452 = vmatmul.mubr.msk.f32.vlgmr.msra.gmra.mrb[0].mxu0 %vm418_vm1, %v404_v16  ;;  %2476 = vmatprep.mubr.msk.f32.mxu1 %vm2924_vm0, %v2925_v1  ;;  %p2839_p0 = pneg %p2838_p4 }
  0xbd   : > { %2469 = vmatprep.mubr.msk.f32.mxu0 %vm2924_vm0, %v2925_v1 }
 0x18e   : > { %v2464_v18 = vpop.f32.mrb[0].mxu1 }
 0x18f   : > { %v3272_v19 = vadd.f32 %v2464_v18, %v2365_v17  ;;  %v575_v20 = vpop.f32.mrb[1].mxu1  ;;  %v488_v21 = vpop.f32.mrb[0].mxu0 }
 0x190   : > { %v2453_v22 = vpop.f32.mrb[1].mxu0  ;;  %v3279_v24 = vadd.f32 %v2365_v17, %v575_v20  ;;  %v489_v25 = vadd.f32 %v2363_v23, %v488_v21 }
 0x191   : > { %741 = vrot.lane.b32.xlu1 %v3272_v19, %s2926_s12  ;;  %735 = vrot.lane.b32.xlu0 %v3272_v19, %s2927_s19 }
 0x192   : > { %v3283_v26 = vmul.f32 0.35355338, %v489_v25 }
 0x195   : > { %739 = vrot.lane.b32.xlu1 %v3279_v24, %s2926_s12  ;;  %733 = vrot.lane.b32.xlu0 %v3279_v24, %s2927_s19 }
 0x199   : > { %747 = vrot.lane.b32.xlu1 %v3272_v19, %s2928_s21  ;;  %745 = vrot.lane.b32.xlu0 %v3279_v24, %s2928_s21 }
 0x19d   : > { %589 = vrot.lane.b32.xlu1 %v3283_v26, %s2926_s12  ;;  %586 = vrot.lane.b32.xlu0 %v3283_v26, %s2927_s19  ;;  %s3508_s19 = scalar_lea.hbm %s3561_s8, %s2399_s10 }
 0x1a1   : > { %592 = vrot.lane.b32.xlu0 %v3283_v26, %s2928_s21  ;;  %s2842_s21 = scalar_lea.vmem %s2841_s20, 256 }
 0x1a2   : > { %p2844_p6 = scmp.lt.s32.totalorder %s2842_s21, %s2836_s9 }
 0x1a4   : > { %p2845_p10 = por %p2844_p6, %p2843_p8 }
 0x1a6   : > { %p2846_p3 = pnand %p2845_p10, %p2839_p0 }
 0x203   : > { %v3290_v30 = vpop.permute.xlu1 %741  ;;  %v3292_v31 = vpop.permute.xlu0 %735 }
 0x204   : > { %v819_v39 = vcombine.low %v3272_v19, %v3290_v30  ;;  %v820_v40 = vcombine.high %v3272_v19, %v3290_v30 }
 0x206   : > { %v827_v50 = vrot.slane %v819_v39, %v3298_v38  ;;  %v834_v51 = vrot.slane %v820_v40, %v3298_v38 }
 0x207   : > { %v3294_v36 = vpop.permute.xlu1 %739  ;;  %v3296_v37 = vpop.permute.xlu0 %733 }
 0x208   : > { %v751_v42 = vcombine.low %v3279_v24, %v3294_v36  ;;  %v752_v43 = vcombine.high %v3279_v24, %v3294_v36 }
 0x20a   : > { %v759_v57 = vrot.slane %v751_v42, %v3298_v38  ;;  %v766_v58 = vrot.slane %v752_v43, %v3298_v38 }
 0x20b   : > { %v3308_v44 = vpop.permute.xlu1 %747  ;;  %v3310_v45 = vpop.permute.xlu0 %745 }
 0x20c   : > { %v835_v46 = vcombine.low %v3292_v31, %v3308_v44  ;;  %v836_v47 = vcombine.high %v3292_v31, %v3308_v44  ;;  %v767_v48 = vcombine.low %v3296_v37, %v3310_v45  ;;  %v768_v49 = vcombine.high %v3296_v37, %v3310_v45 }
 0x20e   : > { %v843_v53 = vrot.slane %v835_v46, %v3298_v38  ;;  %v850_v54 = vrot.slane %v836_v47, %v3298_v38  ;;  %v775_v55 = vrot.slane %v767_v48, %v3298_v38  ;;  %v782_v56 = vrot.slane %v768_v49, %v3298_v38 }
 0x20f   : > { %v587_v5 = vpop.permute.xlu0 %586  ;;  %v590_v35 = vpop.permute.xlu1 %589 }
 0x210   : > { %v851_v59 = vcombine.low %v827_v50, %v843_v53  ;;  %v852_v60 = vcombine.high %v827_v50, %v843_v53  ;;  %v867_v61 = vcombine.low %v834_v51, %v850_v54  ;;  %v868_v62 = vcombine.high %v834_v51, %v850_v54 }
 0x211   : > { %v783_v63 = vcombine.low %v759_v57, %v775_v55  ;;  %v784_v2 = vcombine.high %v759_v57, %v775_v55  ;;  %v799_v3 = vcombine.low %v766_v58, %v782_v56  ;;  %v800_v4 = vcombine.high %v766_v58, %v782_v56 }
 0x212   : > { %v859_v6 = vrot.slane %v851_v59, %v3322_v52  ;;  %v866_v7 = vrot.slane %v852_v60, %v3322_v52  ;;  %v875_v8 = vrot.slane %v867_v61, %v3322_v52  ;;  %v882_v9 = vrot.slane %v868_v62, %v3322_v52 }
 0x213   : > { %v791_v10 = vrot.slane %v783_v63, %v3322_v52  ;;  %v798_v11 = vrot.slane %v784_v2, %v3322_v52  ;;  %v807_v12 = vrot.slane %v799_v3, %v3322_v52  ;;  %v814_v13 = vrot.slane %v800_v4, %v3322_v52  ;;  %v593_v39 = vpop.permute.xlu0 %592 }
 0x214   : > { %v955_v14 = vcombine.low %v859_v6, %v866_v7  ;;  %v2372_v15 = vcombine.high %v859_v6, %v866_v7  ;;  %v971_v16 = vcombine.low %v875_v8, %v882_v9  ;;  %v2373_v17 = vcombine.high %v875_v8, %v882_v9 }
 0x215   : > { %v887_v18 = vcombine.low %v791_v10, %v798_v11  ;;  %v2370_v20 = vcombine.high %v791_v10, %v798_v11  ;;  %v903_v21 = vcombine.low %v807_v12, %v814_v13  ;;  %v2371_v22 = vcombine.high %v807_v12, %v814_v13 }
 0x216   : > { %v962_v23 = vrot.slane %v955_v14, %v3298_v38  ;;  %v970_v25 = vrot.slane %v2372_v15, %v3298_v38  ;;  %v978_v27 = vrot.slane %v971_v16, %v3298_v38  ;;  %v986_v28 = vrot.slane %v2373_v17, %v3298_v38 }
 0x217   : > { %v894_v29 = vrot.slane %v887_v18, %v3298_v38  ;;  %v902_v32 = vrot.slane %v2370_v20, %v3298_v38  ;;  %v910_v33 = vrot.slane %v903_v21, %v3298_v38  ;;  %v918_v34 = vrot.slane %v2371_v22, %v3298_v38 }
 0x218   : > { %v987_v40 = vcombine.low %v962_v23, %v970_v25  ;;  %v1003_v41 = vcombine.low %v978_v27, %v986_v28  ;;  %v988_v42 = vcombine.high %v962_v23, %v970_v25  ;;  %v1004_v43 = vcombine.high %v978_v27, %v986_v28 }
 0x219   : > { %v919_v46 = vcombine.low %v894_v29, %v902_v32  ;;  %v935_v47 = vcombine.low %v910_v33, %v918_v34  ;;  %v595_v48 = vcombine.low %v3283_v26, %v590_v35  ;;  %v596_v49 = vcombine.high %v3283_v26, %v590_v35 }
 0x21a   : > { %v611_v50 = vcombine.low %v587_v5, %v593_v39  ;;  %v612_v51 = vcombine.high %v587_v5, %v593_v39  ;;  %v995_v55 = vrot.slane %v987_v40, %v3322_v52  ;;  %v1011_v56 = vrot.slane %v1003_v41, %v3322_v52 }
 0x21b   : > { %v927_v53 = vrot.slane %v919_v46, %v3322_v52  ;;  %v943_v54 = vrot.slane %v935_v47, %v3322_v52  ;;  %v603_v57 = vrot.slane %v595_v48, %v3298_v38  ;;  %v610_v58 = vrot.slane %v596_v49, %v3298_v38 }
 0x21c   : > { %v619_v59 = vrot.slane %v611_v50, %v3298_v38  ;;  %v626_v60 = vrot.slane %v612_v51, %v3298_v38  ;;  %v1019_v26 = vcombine.low %v995_v55, %v1011_v56  ;;  %v1020_v63 = vcombine.high %v995_v55, %v1011_v56 }
 0x21d   : > { %v951_v61 = vcombine.low %v927_v53, %v943_v54  ;;  %v952_v62 = vcombine.high %v927_v53, %v943_v54  ;;  %v920_v7 = vcombine.high %v894_v29, %v902_v32  ;;  %v936_v8 = vcombine.high %v910_v33, %v918_v34 }
 0x21e   : > { %v627_v2 = vcombine.low %v603_v57, %v619_v59  ;;  %v628_v3 = vcombine.high %v603_v57, %v619_v59  ;;  %v643_v4 = vcombine.low %v610_v58, %v626_v60  ;;  %v644_v5 = vcombine.high %v610_v58, %v626_v60 }
 0x21f   : > { %v2547_v9 = vpack.c.bf16 %v1019_v26, %v951_v61  ;;  %v2551_v10 = vpack.c.bf16 %v1020_v63, %v952_v62  ;;  %v934_v20 = vrot.slane %v920_v7, %v3322_v52  ;;  %v950_v21 = vrot.slane %v936_v8, %v3322_v52 }
 0x220   : > { %v635_v11 = vrot.slane %v627_v2, %v3322_v52  ;;  %v642_v12 = vrot.slane %v628_v3, %v3322_v52  ;;  %v651_v13 = vrot.slane %v643_v4, %v3322_v52  ;;  %v658_v14 = vrot.slane %v644_v5, %v3322_v52 }
 0x221   : > { %2549 = vmatpush3.bf16.xpose.msk.msra.mxu0 %vm3358_vm3, %v2547_v9  ;;  %2553 = vmatpush3.bf16.xpose.msk.msra.mxu1 %vm3358_vm3, %v2551_v10  ;;  %v1002_v22 = vrot.slane %v988_v42, %v3322_v52  ;;  %v1018_v23 = vrot.slane %v1004_v43, %v3322_v52  ;;  %v953_v34 = vcombine.low %v934_v20, %v950_v21 }
 0x222   : > { %v663_v15 = vcombine.low %v635_v11, %v642_v12  ;;  %v2368_v16 = vcombine.high %v635_v11, %v642_v12  ;;  %v679_v17 = vcombine.low %v651_v13, %v658_v14  ;;  %v2369_v18 = vcombine.high %v651_v13, %v658_v14  ;;  %2554 = vmatprep.subr.bf16.mxu0 %v2923_v0 }
 0x223   : > { %2558 = vmatprep.subr.bf16.mxu1 %v2923_v0  ;;  %v1021_v35 = vcombine.low %v1002_v22, %v1018_v23  ;;  %v954_v39 = vcombine.high %v934_v20, %v950_v21  ;;  %v1022_v40 = vcombine.high %v1002_v22, %v1018_v23 }
 0x224   : > { %v670_v25 = vrot.slane %v663_v15, %v3298_v38  ;;  %v678_v27 = vrot.slane %v2368_v16, %v3298_v38  ;;  %v686_v28 = vrot.slane %v679_v17, %v3298_v38  ;;  %v694_v29 = vrot.slane %v2369_v18, %v3298_v38 }
 0x225   : > { %v2555_v49 = vpack.c.bf16 %v1021_v35, %v953_v34  ;;  %v2559_v50 = vpack.c.bf16 %v1022_v40, %v954_v39 }
 0x226   : > { %v695_v32 = vcombine.low %v670_v25, %v678_v27  ;;  %v711_v33 = vcombine.low %v686_v28, %v694_v29  ;;  %v696_v46 = vcombine.high %v670_v25, %v678_v27  ;;  %v712_v43 = vcombine.high %v686_v28, %v694_v29 }
 0x228   : > { %v703_v41 = vrot.slane %v695_v32, %v3322_v52  ;;  %v719_v42 = vrot.slane %v711_v33, %v3322_v52  ;;  %v710_v51 = vrot.slane %v696_v46, %v3322_v52  ;;  %v726_v53 = vrot.slane %v712_v43, %v3322_v52 }
 0x22a   : > { %v727_v47 = vcombine.low %v703_v41, %v719_v42  ;;  %v728_v48 = vcombine.high %v703_v41, %v719_v42  ;;  %v729_v54 = vcombine.low %v710_v51, %v726_v53  ;;  %v730_v55 = vcombine.high %v710_v51, %v726_v53 }
 0x22c   : > { %2470 = vmatmul.mubr.msk.f32.vlgmr.msra.gmra.mrb[2].mxu0 %vm1319_vm2, %v727_v47  ;;  %2477 = vmatmul.mubr.msk.f32.vlgmr.msra.gmra.mrb[2].mxu1 %vm1319_vm2, %v728_v48 }
 0x22d   : > { %2557 = vmatpush3.bf16.xpose.msk.msra.mxu0 %vm3358_vm3, %v2555_v49  ;;  %2561 = vmatpush3.bf16.xpose.msk.msra.mxu1 %vm3358_vm3, %v2559_v50 }
 0x22e   : > { %2483 = vmatprep.mubr.msk.f32.mxu0 %vm2924_vm0, %v2925_v1  ;;  %2490 = vmatprep.mubr.msk.f32.mxu1 %vm2924_vm0, %v2925_v1 }
 0x22f   : > { %2562 = vmatprep.subr.bf16.mxu1 %v2923_v0  ;;  %2568 = vmatprep.subr.bf16.mxu0 %v2923_v0 }
 0x234   : > { %2484 = vmatmul.mubr.msk.f32.vlgmr.msra.gmra.mrb[4].mxu0 %vm1319_vm2, %v729_v54  ;;  %2491 = vmatmul.mubr.msk.f32.vlgmr.msra.gmra.mrb[4].mxu1 %vm1319_vm2, %v730_v55 }
 0x235   : > { %2497 = vmatprep.mubr.msk.f32.mxu1 %vm2924_vm0, %v2925_v1  ;;  %2511 = vmatprep.mubr.msk.f32.mxu0 %vm2924_vm0, %v2925_v1 }
 0x2ff   : > { %v1395_v56 = vpop.f32.mrb[2].mxu0  ;;  %v1474_v57 = vpop.f32.mrb[2].mxu1 }
 0x300   : > { %v2471_v58 = vpop.f32.mrb[3].mxu0  ;;  %v2478_v59 = vpop.f32.mrb[3].mxu1  ;;  %v1640_v60 = vsel %vm1636_vm4, %v1474_v57, -inf  ;;  %v1637_v61 = vsel %vm1636_vm4, %v1395_v56, -inf }
 0x301   : > { %1641 = vmax.xlane.f32.xlu0 %v1640_v60  ;;  %1638 = vmax.xlane.f32.xlu1 %v1637_v61 }
 0x307   : > { %v1553_v26 = vpop.f32.mrb[4].mxu0  ;;  %v1632_v62 = vpop.f32.mrb[4].mxu1 }
 0x308   : > { %v2485_v63 = vpop.f32.mrb[5].mxu0  ;;  %v2492_v2 = vpop.f32.mrb[5].mxu1  ;;  %v1646_v3 = vsel %vm1636_vm4, %v1632_v62, -inf  ;;  %v1643_v4 = vsel %vm1636_vm4, %v1553_v26, -inf }
 0x309   : > { %1647 = vmax.xlane.f32.xlu1 %v1646_v3  ;;  %1644 = vmax.xlane.f32.xlu0 %v1643_v4 }
 0x31a   : > { %1023 = vrot.lane.b32.xlu1 %v3279_v24, %s2931_s2 }
 0x31e   : > { %1027 = vrot.lane.b32.xlu1 %v3296_v37, %s2931_s2 }
 0x31f   : > { %1025 = vrot.lane.b32.xlu0 %v3272_v19, %s2931_s2 }
 0x322   : > { %1029 = vrot.lane.b32.xlu1 %v3292_v31, %s2931_s2 }
 0x323   : > { %1031 = vrot.lane.b32.xlu0 %v3294_v36, %s2931_s2 }
 0x326   : > { %1033 = vrot.lane.b32.xlu1 %v3290_v30, %s2931_s2 }
 0x327   : > { %1035 = vrot.lane.b32.xlu0 %v3310_v45, %s2931_s2 }
 0x32a   : > { %1037 = vrot.lane.b32.xlu1 %v3308_v44, %s2931_s2 }
 0x38e   : > { %v1642_v5 = vpop.xlane.xlu0 %1641  ;;  %v1639_v6 = vpop.xlane.xlu1 %1638 }
 0x38f   : > { %v1650_v7 = vsub.f32 %v1474_v57, %v1642_v5  ;;  %v1649_v8 = vsub.f32 %v1395_v56, %v1639_v6 }
 0x391   : > { %v1653_v9 = vmul.f32 1.442695, %v1649_v8  ;;  %v1655_v24 = vmul.f32 1.442695, %v1650_v7 }
 0x393   : > { %2676 = vpow2.f32 %v1653_v9 }
 0x394   : > { %2678 = vpow2.f32 %v1655_v24 }
 0x396   : > { %v1648_v37 = vpop.xlane.xlu1 %1647  ;;  %v1645_v19 = vpop.xlane.xlu0 %1644 }
 0x397   : > { %v1652_v10 = vsub.f32 %v1632_v62, %v1648_v37  ;;  %v1651_v31 = vsub.f32 %v1553_v26, %v1645_v19 }
 0x399   : > { %v1659_v11 = vmul.f32 1.442695, %v1652_v10  ;;  %v1657_v36 = vmul.f32 1.442695, %v1651_v31 }
 0x39a   : > { %v1024_v12 = vpop.permute.xlu1 %1023  ;;  %v1026_v30 = vpop.permute.xlu0 %1025 }
 0x39b   : > { %2680 = vpow2.f32 %v1659_v11 }
 0x39c   : > { %2682 = vpow2.f32 %v1657_v36 }
 0x39d   : > { %v3414_v45 = vpop.eup %2676 }
 0x39e   : > { %v1028_v44 = vpop.permute.xlu1 %1027  ;;  %v1032_v13 = vpop.permute.xlu0 %1031  ;;  %v1661_v14 = vsel %vm1636_vm4, %v3414_v45, 0.0 }
 0x39f   : > { %v3418_v15 = vpop.eup %2678  ;;  %1662 = vadd.xlane.f32.xlu0 %v1661_v14  ;;  %v1047_v16 = vcombine.low %v1024_v12, %v1032_v13  ;;  %v1048_v17 = vcombine.high %v1024_v12, %v1032_v13 }
 0x3a0   : > { %v1664_v23 = vsel %vm1636_vm4, %v3418_v15, 0.0 }
 0x3a1   : > { %v1055_v27 = vrot.slane %v1047_v16, %v3298_v38  ;;  %v1062_v28 = vrot.slane %v1048_v17, %v3298_v38 }
 0x3a2   : > { %v1030_v18 = vpop.permute.xlu1 %1029  ;;  %v1036_v20 = vpop.permute.xlu0 %1035 }
 0x3a3   : > { %v1063_v21 = vcombine.low %v1028_v44, %v1036_v20  ;;  %v1064_v22 = vcombine.high %v1028_v44, %v1036_v20  ;;  %1665 = vadd.xlane.f32.xlu0 %v1664_v23 }
 0x3a5   : > { %v3422_v25 = vpop.eup %2680  ;;  %v1071_v29 = vrot.slane %v1063_v21, %v3298_v38  ;;  %v1078_v32 = vrot.slane %v1064_v22, %v3298_v38 }
 0x3a6   : > { %v3428_v33 = vpop.eup %2682  ;;  %v1034_v34 = vpop.permute.xlu1 %1033  ;;  %v1670_v35 = vsel %vm1636_vm4, %v3422_v25, 0.0 }
 0x3a7   : > { %v1079_v39 = vcombine.low %v1055_v27, %v1071_v29  ;;  %v1080_v40 = vcombine.high %v1055_v27, %v1071_v29  ;;  %v1095_v41 = vcombine.low %v1062_v28, %v1078_v32  ;;  %v1096_v42 = vcombine.high %v1062_v28, %v1078_v32  ;;  %1671 = vadd.xlane.f32.xlu0 %v1670_v35 }
 0x3a8   : > { %v1667_v46 = vsel %vm1636_vm4, %v3428_v33, 0.0  ;;  %v1115_v50 = vcombine.low %v1026_v30, %v1034_v34  ;;  %v1116_v51 = vcombine.high %v1026_v30, %v1034_v34 }
 0x3a9   : > { %v1087_v43 = vrot.slane %v1079_v39, %v3322_v52  ;;  %v1094_v47 = vrot.slane %v1080_v40, %v3322_v52  ;;  %v1103_v48 = vrot.slane %v1095_v41, %v3322_v52  ;;  %v1110_v49 = vrot.slane %v1096_v42, %v3322_v52  ;;  %1668 = vadd.xlane.f32.xlu1 %v1667_v46 }
 0x3aa   : > { %v1038_v53 = vpop.permute.xlu1 %1037  ;;  %v1123_v63 = vrot.slane %v1115_v50, %v3298_v38  ;;  %v1130_v2 = vrot.slane %v1116_v51, %v3298_v38 }
 0x3ab   : > { %v1183_v54 = vcombine.low %v1087_v43, %v1094_v47  ;;  %v2374_v55 = vcombine.high %v1087_v43, %v1094_v47  ;;  %v1199_v56 = vcombine.low %v1103_v48, %v1110_v49  ;;  %v2375_v57 = vcombine.high %v1103_v48, %v1110_v49 }
 0x3ac   : > { %v1131_v58 = vcombine.low %v1030_v18, %v1038_v53  ;;  %v1132_v59 = vcombine.high %v1030_v18, %v1038_v53 }
 0x3ad   : > { %v1190_v60 = vrot.slane %v1183_v54, %v3298_v38  ;;  %v1198_v61 = vrot.slane %v2374_v55, %v3298_v38  ;;  %v1206_v26 = vrot.slane %v1199_v56, %v3298_v38  ;;  %v1214_v62 = vrot.slane %v2375_v57, %v3298_v38 }
 0x3ae   : > { %v1139_v3 = vrot.slane %v1131_v58, %v3298_v38  ;;  %v1146_v4 = vrot.slane %v1132_v59, %v3298_v38 }
 0x3af   : > { %v1215_v5 = vcombine.low %v1190_v60, %v1198_v61  ;;  %v1231_v6 = vcombine.low %v1206_v26, %v1214_v62  ;;  %v1216_v7 = vcombine.high %v1190_v60, %v1198_v61  ;;  %v1232_v8 = vcombine.high %v1206_v26, %v1214_v62 }
 0x3b0   : > { %v1147_v9 = vcombine.low %v1123_v63, %v1139_v3  ;;  %v1148_v24 = vcombine.high %v1123_v63, %v1139_v3  ;;  %v1163_v37 = vcombine.low %v1130_v2, %v1146_v4  ;;  %v1164_v19 = vcombine.high %v1130_v2, %v1146_v4  ;;  %v2126_v4 = vld [vmem:[#allocation10 + $0x8] sm:$0xff] }
 0x3b1   : > { %v1223_v10 = vrot.slane %v1215_v5, %v3322_v52  ;;  %v1239_v31 = vrot.slane %v1231_v6, %v3322_v52  ;;  %v1230_v11 = vrot.slane %v1216_v7, %v3322_v52  ;;  %v1246_v36 = vrot.slane %v1232_v8, %v3322_v52 }
 0x3b2   : > { %v1155_v12 = vrot.slane %v1147_v9, %v3322_v52  ;;  %v1162_v30 = vrot.slane %v1148_v24, %v3322_v52  ;;  %v1171_v44 = vrot.slane %v1163_v37, %v3322_v52  ;;  %v1178_v13 = vrot.slane %v1164_v19, %v3322_v52 }
 0x3b3   : > { %v1248_v14 = vcombine.high %v1223_v10, %v1239_v31  ;;  %v1250_v16 = vcombine.high %v1230_v11, %v1246_v36  ;;  %v1247_v46 = vcombine.low %v1223_v10, %v1239_v31  ;;  %v1249_v43 = vcombine.low %v1230_v11, %v1246_v36 }
 0x3b4   : > { %v1251_v17 = vcombine.low %v1155_v12, %v1162_v30  ;;  %v2376_v18 = vcombine.high %v1155_v12, %v1162_v30  ;;  %v1267_v20 = vcombine.low %v1171_v44, %v1178_v13  ;;  %v2377_v21 = vcombine.high %v1171_v44, %v1178_v13 }
 0x3b6   : > { %v1258_v22 = vrot.slane %v1251_v17, %v3298_v38  ;;  %v1266_v23 = vrot.slane %v2376_v18, %v3298_v38  ;;  %v1274_v27 = vrot.slane %v1267_v20, %v3298_v38  ;;  %v1282_v28 = vrot.slane %v2377_v21, %v3298_v38  ;;  %v2128_v17 = vld [vmem:[#allocation10 + $0x18] sm:$0xff] }
 0x3b8   : > { %v1283_v29 = vcombine.low %v1258_v22, %v1266_v23  ;;  %v1299_v32 = vcombine.low %v1274_v27, %v1282_v28  ;;  %v1284_v34 = vcombine.high %v1258_v22, %v1266_v23  ;;  %v1300_v35 = vcombine.high %v1274_v27, %v1282_v28 }
 0x3ba   : > { %v1291_v39 = vrot.slane %v1283_v29, %v3322_v52  ;;  %v1307_v40 = vrot.slane %v1299_v32, %v3322_v52  ;;  %v1298_v41 = vrot.slane %v1284_v34, %v3322_v52  ;;  %v1314_v42 = vrot.slane %v1300_v35, %v3322_v52 }
 0x3bc   : > { %v1315_v47 = vcombine.low %v1291_v39, %v1307_v40  ;;  %v1317_v48 = vcombine.low %v1298_v41, %v1314_v42  ;;  %v1316_v49 = vcombine.high %v1291_v39, %v1307_v40  ;;  %v1318_v50 = vcombine.high %v1298_v41, %v1314_v42 }
 0x3be   : > { %v2563_v51 = vpack.c.bf16 %v1315_v47, %v1247_v46  ;;  %v2569_v53 = vpack.c.bf16 %v1317_v48, %v1249_v43  ;;  %v2566_v54 = vpack.c.bf16 %v1316_v49, %v1248_v14  ;;  %v2572_v55 = vpack.c.bf16 %v1318_v50, %v1250_v16  ;;  %v2127_v16 = vld [vmem:[#allocation10 + $0x10] sm:$0xff] }
 0x3bf   : > { %v2578_v23 = vpack.c.bf16 %v2128_v17, %v2127_v16 }
 0x3c0   : > { %2564 = vmatpush3.bf16.msra.mxu1 %v2563_v51  ;;  %2570 = vmatpush3.bf16.msra.mxu0 %v2569_v53 }
 0x3c1   : > { %2565 = vmatprep.subr.bf16.mxu1 %v2923_v0  ;;  %2574 = vmatprep.subr.bf16.mxu0 %v2923_v0 }
 0x42c   : > { %v1663_v56 = vpop.xlane.xlu0 %1662 }
 0x42d   : > { %2684 = vrcp.f32 %v1663_v56 }
 0x430   : > { %v1666_v57 = vpop.xlane.xlu0 %1665 }
 0x431   : > { %2686 = vrcp.f32 %v1666_v57 }
 0x434   : > { %v1672_v58 = vpop.xlane.xlu0 %1671 }
 0x435   : > { %2688 = vrcp.f32 %v1672_v58 }
 0x436   : > { %v1669_v59 = vpop.xlane.xlu1 %1668 }
 0x437   : > { %2690 = vrcp.f32 %v1669_v59  ;;  %v2685_v60 = vpop.eup %2684 }
 0x438   : > { %v1677_v61 = vmul.f32 %v2685_v60, %v3414_v45  ;;  %v2396_v60 = vld [vmem:[%s3560_s7] ss:$0 sm:$0xff] }
 0x43a   : > { %2498 = vmatmul.mubr.msk.f32.vlgmr.msra.gmra.mrb[6].mxu1 %vm1636_vm4, %v1677_v61 }
 0x43b   : > { %v2687_v26 = vpop.eup %2686  ;;  %2567 = vmatpush3.bf16.msra.mxu1 %v2566_v54  ;;  %2504 = vmatprep.mubr.msk.f32.mxu1 %vm2924_vm0, %v2925_v1 }
 0x43c   : > { %v1678_v62 = vmul.f32 %v2687_v26, %v3418_v15  ;;  %2571 = vmatprep.subr.bf16.mxu1 %v2923_v0  ;;  %v2125_v15 = vld [vmem:[#allocation10] sm:$0xff] }
 0x43d   : > { %v2575_v5 = vpack.c.bf16 %v2126_v4, %v2125_v15 }
 0x43e   : > { %2505 = vmatmul.mubr.msk.f32.vlgmr.msra.gmra.mrb[8].mxu1 %vm1636_vm4, %v1678_v62 }
 0x43f   : > { %v2689_v63 = vpop.eup %2688  ;;  %2573 = vmatpush3.bf16.msra.mxu1 %v2572_v55  ;;  %2518 = vmatprep.mubr.msk.f32.mxu1 %vm2924_vm0, %v2925_v1 }
 0x440   : > { %v1680_v45 = vmul.f32 %v2689_v63, %v3422_v25 }
 0x441   : > { %v2691_v2 = vpop.eup %2690 }
 0x442   : > { %v1679_v3 = vmul.f32 %v2691_v2, %v3428_v33  ;;  %2519 = vmatmul.mubr.msk.f32.vlgmr.msra.gmra.mrb[10].mxu1 %vm1636_vm4, %v1680_v45 }
 0x444   : > { %2512 = vmatmul.mubr.msk.f32.vlgmr.msra.gmra.mrb[6].mxu0 %vm1636_vm4, %v1679_v3 }
 0x445   : > { %2529 = vmatprep.mubr.msk.f32.mxu0 %vm2924_vm0, %v2925_v1  ;;  %2576 = vmatpush3.bf16.msra.mxu0 %v2575_v5 }
 0x446   : > { %2577 = vmatprep.subr.bf16.mxu0 %v2923_v0 }
 0x449   : > { %2579 = vmatpush3.bf16.msra.mxu0 %v2578_v23 }
 0x50d   : > { %v1750_v6 = vpop.f32.mrb[6].mxu1 }
 0x50e   : > { %v2499_v7 = vpop.f32.mrb[7].mxu1 }
 0x511   : > { %v1823_v8 = vpop.f32.mrb[8].mxu1 }
 0x512   : > { %v2506_v9 = vpop.f32.mrb[9].mxu1 }
 0x515   : > { %v1969_v25 = vpop.f32.mrb[10].mxu1 }
 0x516   : > { %v1989_v33 = vcombine.low %v1823_v8, %v1969_v25  ;;  %v1990_v37 = vcombine.high %v1823_v8, %v1969_v25  ;;  %v2520_v19 = vpop.f32.mrb[11].mxu1 }
 0x517   : > { %v1896_v24 = vpop.f32.mrb[6].mxu0 }
 0x518   : > { %v1973_v10 = vcombine.low %v1750_v6, %v1896_v24  ;;  %v1974_v31 = vcombine.high %v1750_v6, %v1896_v24  ;;  %v2513_v11 = vpop.f32.mrb[7].mxu0  ;;  %v1997_v1 = vrot.slane %v1989_v33, %v3298_v38  ;;  %v2004_v36 = vrot.slane %v1990_v37, %v3298_v38 }
 0x51a   : > { %v1981_v12 = vrot.slane %v1973_v10, %v3298_v38  ;;  %v1988_v0 = vrot.slane %v1974_v31, %v3298_v38 }
 0x51c   : > { %v2005_v30 = vcombine.low %v1981_v12, %v1997_v1  ;;  %v2006_v44 = vcombine.high %v1981_v12, %v1997_v1  ;;  %v2021_v13 = vcombine.low %v1988_v0, %v2004_v36  ;;  %v2022_v14 = vcombine.high %v1988_v0, %v2004_v36 }
 0x51e   : > { %v2013_v18 = vrot.slane %v2005_v30, %v3322_v52  ;;  %v2020_v20 = vrot.slane %v2006_v44, %v3322_v52  ;;  %v2029_v21 = vrot.slane %v2021_v13, %v3322_v52  ;;  %v2036_v22 = vrot.slane %v2022_v14, %v3322_v52 }
 0x520   : > { %v2041_v27 = vcombine.low %v2013_v18, %v2020_v20  ;;  %v2394_v28 = vcombine.high %v2013_v18, %v2020_v20  ;;  %v2057_v29 = vcombine.low %v2029_v21, %v2036_v22  ;;  %v2395_v32 = vcombine.high %v2029_v21, %v2036_v22 }
 0x522   : > { %v2048_v34 = vrot.slane %v2041_v27, %v3298_v38  ;;  %v2056_v35 = vrot.slane %v2394_v28, %v3298_v38  ;;  %v2064_v39 = vrot.slane %v2057_v29, %v3298_v38  ;;  %v2072_v40 = vrot.slane %v2395_v32, %v3298_v38 }
 0x524   : > { %v2074_v41 = vcombine.high %v2048_v34, %v2056_v35  ;;  %v2090_v42 = vcombine.high %v2064_v39, %v2072_v40  ;;  %v2073_v46 = vcombine.low %v2048_v34, %v2056_v35  ;;  %v2089_v43 = vcombine.low %v2064_v39, %v2072_v40 }
 0x526   : > { %v2088_v47 = vrot.slane %v2074_v41, %v3322_v52  ;;  %v2104_v48 = vrot.slane %v2090_v42, %v3322_v52  ;;  %v2081_v49 = vrot.slane %v2073_v46, %v3322_v52  ;;  %v2097_v50 = vrot.slane %v2089_v43, %v3322_v52 }
 0x528   : > { %v2107_v51 = vcombine.low %v2088_v47, %v2104_v48  ;;  %v2106_v53 = vcombine.high %v2081_v49, %v2097_v50  ;;  %v2108_v54 = vcombine.high %v2088_v47, %v2104_v48  ;;  %v2105_v55 = vcombine.low %v2081_v49, %v2097_v50 }
 0x52a   : > { %2114 = vrot.lane.b32.xlu1 %v2107_v51, %s2932_s25  ;;  %2110 = vrot.lane.b32.xlu0 %v2106_v53, %s2933_s18 }
 0x52e   : > { %2118 = vrot.lane.b32.xlu1 %v2108_v54, %s2934_s27 }
 0x59c   : > { %v2115_v38 = vpop.permute.xlu1 %2114  ;;  %v2111_v56 = vpop.permute.xlu0 %2110 }
 0x59d   : > { %v2121_v57 = vsel %vm1319_vm2, %v2105_v55, %v2111_v56 }
 0x59e   : > { %v2122_v52 = vsel %vm1636_vm4, %v2121_v57, %v2115_v38 }
 0x5a0   : > { %v2119_v58 = vpop.permute.xlu1 %2118 }
 0x5a1   : > { %v2124_v59 = vsel %vm2123_vm5, %v2122_v52, %v2119_v58 }
 0x5a2   : > { %2530 = vmatmul.mubr.msk.f32.vlgmr.msra.gmra.mrb[8].mxu0 %vm418_vm1, %v2124_v59 }
 0x675   : > { %v2205_v61 = vpop.f32.mrb[8].mxu0 }
 0x676   : > { %v2206_v26 = vadd.f32 %v2396_v60, %v2205_v61  ;;  %v2531_v62 = vpop.f32.mrb[9].mxu0 }
 0x678   : > { %2209 = vst.msk [vmem:[%s403_s14] sm:$0xff] %vm418_vm1, %v2206_v26 }
 0x679   : > { %2849 = shalt.err (!%p2846_p3)
}
 0x67a   : > { %s2850_s24 = scalar_lea.hbm %s3508_s19, 128  ;;  %s2854_s18 = scalar_lea.hbm %s3561_s8, 256 }
 0x67b   : > { %p2851_p9 = scmp.ne.s32.totalorder %s3508_s19, %s2850_s24  ;;  %p2855_p7 = scmp.lt.u32.totalorder %s3508_s19, %s3561_s8 }
 0x67c   : > { %p2856_p12 = scmp.lt.u32.totalorder %s2854_s18, %s2850_s24  ;;  %p2858_p2 = scmp.lt.u32.totalorder %s2850_s24, %s3508_s19 }
 0x67d   : > { %p2852_p13 = pnand %p2851_p9, %p3135_p5 }
 0x67e   : > { %p2857_p1 = por %p2856_p12, %p2855_p7 }
 0x67f   : > { %p2853_p11 = pneg %p2852_p13 }
 0x680   : > { %p2859_p4 = por %p2858_p2, %p2857_p1 }
 0x682   : > { %p2860_p0 = pnand %p2859_p4, %p2853_p11 }
 0x684   : > { %2863 = shalt.err (!%p2860_p0)
}
 0x685   : > { %2596 = dma.vmem_to_hbm [thread:$0]  (%p3135_p5), %s3510_s11, 128, %s3508_s19, %s2211_s15  }
 0x686 PF: > { %s3593_s13 = sld [smem:[#allocation17_spill]]  ;;  %s3594_s10 = sld [smem:[#allocation18_spill]] }
 0x687   : > { %p3596_p6 = scmp.ge.s32.totalorder %s2914_s30, 2 }
 0x68c   : > { %s2236_s14 = sand.u32 1, %s3593_s13   ;;  %p3595_p8 = scmp.ne.s32.totalorder %s3594_s10, 0 }
 0x68d   : > { %s2237_s16 = scalar_lea.sflag [#allocation4], %s2236_s14 }
 0x68e   : > { %p2616_p10 = pnand %p3596_p6, %p3595_p8 }
 0x690   : > { %2897 = dma.done.wait (!%p2616_p10), %s2237_s16, 128  }
 0x691   : > { %2899 = vsyncadd (!%p2616_p10), %s2237_s16, 4294967168  ;;  %p25_p3 = scmp.ge.s32.totalorder %s3121_s26, 4   ;;  %s3597_s27 = smov %s2906_s28 }
 0x692   : > { %s3598_s28 = smov %s2910_s29  ;;  %s3599_s29 = smov %s3131_s22 }
 0x693   : > { %s3600_s30 = smov %s3121_s26  ;;  %27 = sbr.rel (!%p25_p3) target bundleno = 11 (0xb), region = 122 }
 0x69a   :  { %2242 = vsyncpa [#allocation3], 1 }
 0x69b   :  { %2244 = vsyncpa [#allocation3 + $0x1], 1 }
 0x69c   :  { %2245 = vsyncpa [#allocation6], 1 }
 0x69d   :  { %2247 = vsyncpa [#allocation6 + $0x1], 1 }
 0x69e   :  { %2248 = vsyncpa [#allocation9], 1 }
 0x69f   :  { %2249 = vsyncpa [#allocation4], 1 }
 0x6a0   :  { %2251 = vsyncpa [#allocation4 + $0x1], 1 }

</bundles_post_ra>
